<compile_context>
chip_gen: v7x
topology: tpu7x:2x2x1
jax: 0.10.0
libtpu: 0.0.40
codegen_flags: <defaults>
</compile_context>

<pallas_src>
import functools
import numpy as np
import jax
import jax.numpy as jnp
from jax import lax
from jax.experimental import pallas as pl
from jax.experimental.pallas import tpu as pltpu

LANE = 128


# ----------------------------------------------------------------------------
# Generation-aware budgets
# ----------------------------------------------------------------------------
@functools.lru_cache(maxsize=None)
def _tpu_budgets():
    """(time-chunk budget bytes, vmem_limit_bytes): big on 128-MiB-VMEM chips, safe on v7x."""
    try:
        kind = jax.devices()[0].device_kind.lower()
    except Exception:
        kind = ""
    if "v7" not in kind and any(v in kind for v in ("v4", "v5", "v6")):
        return 32 * 1024 * 1024, 96 * 1024 * 1024
    return 8 * 1024 * 1024, 48 * 1024 * 1024


def _cp(semantics):
    _, vmem = _tpu_budgets()
    return pltpu.CompilerParams(dimension_semantics=semantics, vmem_limit_bytes=vmem)


# ----------------------------------------------------------------------------
# Pallas kernels
# ----------------------------------------------------------------------------
def proj1_kernel(x_ref, w_ref, b_ref, gf_ref, gb_ref):
    """gates_x = x @ W_in + b for all timesteps / both directions (one big GEMM).

    x: (rb, D), W_in: (D, 8H) = [fwd 4H | bwd 4H] (gate order i|f|o|g), b: (1, 8H).
    Output is split per direction so the recurrence reads every element exactly once.
    """
    x = x_ref[...].astype(w_ref.dtype)
    y = jnp.dot(x, w_ref[...], preferred_element_type=jnp.float32) + b_ref[...]
    g4 = gf_ref.shape[1]
    gf_ref[...] = y[:, :g4].astype(gf_ref.dtype)
    gb_ref[...] = y[:, g4:].astype(gb_ref.dtype)


def proj2_kernel(xf_ref, xb_ref, w_ref, b_ref, gf_ref, gb_ref):
    """Same as proj1 but the layer input is the previous layer's (h_fwd, h_bwd) pair;
    the fwd|bwd concat happens on lanes inside VMEM (no HBM concat pass)."""
    x = jnp.concatenate([xf_ref[...], xb_ref[...]], axis=1).astype(w_ref.dtype)
    y = jnp.dot(x, w_ref[...], preferred_element_type=jnp.float32) + b_ref[...]
    g4 = gf_ref.shape[1]
    gf_ref[...] = y[:, :g4].astype(gf_ref.dtype)
    gb_ref[...] = y[:, g4:].astype(gb_ref.dtype)


def head_kernel(xf_ref, xb_ref, w_ref, b_ref, o_ref):
    """out = sigmoid([h_fwd | h_bwd] @ W + b), output padded to 128 lanes (lane-dense stores)."""
    x = jnp.concatenate([xf_ref[...], xb_ref[...]], axis=1).astype(w_ref.dtype)
    y = jnp.dot(x, w_ref[...], preferred_element_type=jnp.float32) + b_ref[...]
    o_ref[...] = jax.nn.sigmoid(y).astype(o_ref.dtype)


def bilstm_kernel(gxf_ref, gxb_ref, w_ref, hf_ref, hb_ref, h_st, c_st, *, unroll):
    """Fused bidirectional LSTM recurrence: both directions advance in every loop step.

    grid = (time chunk,):
      gxf_ref: (TC, B, 4H)  x@W_ih + b, forward direction, time block k         ([i f o g])
      gxb_ref: (TC, B, 4H)  x@W_ih + b, backward direction, mirrored block K-1-k
      w_ref:   (2H, 8H)     block-diag recurrent weights, interleaved gate columns
                            rows [h_f | h_b], cols [i_f i_b | f_f f_b | o_f o_b | g_f g_b]
      hf_ref:  (TC, B, H)   forward outputs of this chunk
      hb_ref:  (TC, B, H)   backward outputs of the mirrored chunk
      h_st,c_st: (B, 2H) f32 scratch = [fwd | bwd] state, carried across the time axis
    """
    k = pl.program_id(0)

    @pl.when(k == 0)
    def _():
        h_st[...] = jnp.zeros_like(h_st)
        c_st[...] = jnp.zeros_like(c_st)

    TC = gxf_ref.shape[0]
    H = w_ref.shape[0] // 2

    def step(i, carry):
        tf = i            # forward walks its block 0..TC-1 (global time increasing)
        tb = TC - 1 - i   # backward walks its mirrored block TC-1..0 (global time decreasing)
        gf = gxf_ref[tf]  # (B, 4H)
        gb = gxb_ref[tb]  # (B, 4H)
        # Interleave per gate (all slices 128-lane aligned): [i_f i_b | f_f f_b | o_f o_b | g_f g_b]
        gx = jnp.concatenate(
            [gf[:, 0:H],         gb[:, 0:H],
             gf[:, H:2 * H],     gb[:, H:2 * H],
             gf[:, 2 * H:3 * H], gb[:, 2 * H:3 * H],
             gf[:, 3 * H:4 * H], gb[:, 3 * H:4 * H]], axis=1)             # (B, 8H)
        gates = gx + jnp.dot(h_st[...].astype(w_ref.dtype), w_ref[...],
                             preferred_element_type=jnp.float32)          # (B, 8H)
        ifo = jax.nn.sigmoid(gates[:, :6 * H])   # ONE EUP pass over i|f|o of BOTH directions
        g = jnp.tanh(gates[:, 6 * H:])           # ONE EUP pass over g of BOTH directions
        c_new = ifo[:, 2 * H:4 * H] * c_st[...] + ifo[:, :2 * H] * g      # (B, 2H) = [fwd|bwd]
        h_new = ifo[:, 4 * H:6 * H] * jnp.tanh(c_new)
        c_st[...] = c_new
        h_st[...] = h_new
        hf_ref[tf] = h_new[:, :H].astype(hf_ref.dtype)
        hb_ref[tb] = h_new[:, H:].astype(hb_ref.dtype)
        return carry

    lax.fori_loop(0, TC, step, 0, unroll=unroll)


# ----------------------------------------------------------------------------
# Wrappers
# ----------------------------------------------------------------------------
def _round_up(n, m):
    return -(-n // m) * m


def _row_block(n, cap=512):
    return cap if n >= cap else _round_up(n, 8)


def _pad_rows(x, n_pad):
    n = x.shape[0]
    if n_pad == n:
        return x
    return jnp.pad(x, ((0, n_pad - n),) + ((0, 0),) * (x.ndim - 1))


def run_projection(xs, w_in, b_in):
    """xs: (N, D) array (layer 0) or (xf, xb) pair of (N, H) arrays (deeper layers).

    Returns (gxf, gxb), each (N, 4H) f32 = x @ W_in + b with per-direction gate order i|f|o|g.
    """
    pair = isinstance(xs, (tuple, list))
    n = xs[0].shape[0] if pair else xs.shape[0]
    g8 = w_in.shape[1]
    g4 = g8 // 2
    rb = _row_block(n)
    n_pad = _round_up(n, rb)
    grid = (n_pad // rb,)
    out_shape = (jax.ShapeDtypeStruct((n_pad, g4), jnp.float32),
                 jax.ShapeDtypeStruct((n_pad, g4), jnp.float32))
    out_specs = (pl.BlockSpec((rb, g4), lambda r: (r, 0)),
                 pl.BlockSpec((rb, g4), lambda r: (r, 0)))
    w_spec = pl.BlockSpec(tuple(w_in.shape), lambda r: (0, 0))
    b_spec = pl.BlockSpec((1, g8), lambda r: (0, 0))

    if pair:
        xf = _pad_rows(xs[0], n_pad)
        xb = _pad_rows(xs[1], n_pad)
        h = xf.shape[1]
        gxf, gxb = pl.pallas_call(
            proj2_kernel,
            out_shape=out_shape,
            grid=grid,
            in_specs=[pl.BlockSpec((rb, h), lambda r: (r, 0)),
                      pl.BlockSpec((rb, h), lambda r: (r, 0)),
                      w_spec, b_spec],
            out_specs=out_specs,
            compiler_params=_cp(("parallel",)),
        )(xf, xb, w_in, b_in)
    else:
        x = _pad_rows(xs, n_pad)
        d = x.shape[1]
        gxf, gxb = pl.pallas_call(
            proj1_kernel,
            out_shape=out_shape,
            grid=grid,
            in_specs=[pl.BlockSpec((rb, d), lambda r: (r, 0)), w_spec, b_spec],
            out_specs=out_specs,
            compiler_params=_cp(("parallel",)),
        )(x, w_in, b_in)
    return gxf[:n], gxb[:n]


def run_bilstm(gxf, gxb, w_bd, *, unroll=4, max_time_chunk=None):
    """gxf/gxb: (T, B, 4H) precomputed input gates per direction; w_bd: (2H, 8H) block-diag
    interleaved recurrent weights.  Returns (h_fwd, h_bwd), each (T, B, H) f32."""
    T, B, g4 = gxf.shape
    H = g4 // 4
    chunk_bytes, vmem_limit = _tpu_budgets()
    per_t = 2 * (2 * g4 + 2 * H) * B * 4       # double-buffered f32 gxf+gxb+hf+hb rows
    tc = int(max(1, min(T, chunk_bytes // per_t)))
    if max_time_chunk is not None:
        tc = max(1, min(tc, int(max_time_chunk)))
    t_pad = _round_up(T, tc)
    k = t_pad // tc
    if t_pad != T:
        # Zero gate rows with zero state are an exact fixed point of the LSTM step, so the
        # backward direction can start inside the padded tail without perturbing real steps.
        pad = ((0, t_pad - T), (0, 0), (0, 0))
        gxf = jnp.pad(gxf, pad)
        gxb = jnp.pad(gxb, pad)

    hf, hb = pl.pallas_call(
        functools.partial(bilstm_kernel, unroll=max(1, min(unroll, tc))),
        out_shape=(jax.ShapeDtypeStruct((t_pad, B, H), jnp.float32),
                   jax.ShapeDtypeStruct((t_pad, B, H), jnp.float32)),
        grid=(k,),
        in_specs=[pl.BlockSpec((tc, B, g4), lambda i: (i, 0, 0)),
                  pl.BlockSpec((tc, B, g4), lambda i: (k - 1 - i, 0, 0)),
                  pl.BlockSpec((2 * H, 8 * H), lambda i: (0, 0))],
        out_specs=(pl.BlockSpec((tc, B, H), lambda i: (i, 0, 0)),
                   pl.BlockSpec((tc, B, H), lambda i: (k - 1 - i, 0, 0))),
        scratch_shapes=[pltpu.VMEM((B, 2 * H), jnp.float32),
                        pltpu.VMEM((B, 2 * H), jnp.float32)],
        compiler_params=pltpu.CompilerParams(
            dimension_semantics=("arbitrary",),
            vmem_limit_bytes=vmem_limit),
    )(gxf, gxb, w_bd)
    return hf[:T], hb[:T]


def run_head(hf2d, hb2d, w_out, b_out, out_size):
    """(N, H) fwd + (N, H) bwd -> sigmoid([fwd|bwd] @ W + b); 128-lane padded, sliced here."""
    n, H = hf2d.shape
    op = w_out.shape[1]
    rb = _row_block(n)
    n_pad = _round_up(n, rb)
    xf = _pad_rows(hf2d, n_pad)
    xb = _pad_rows(hb2d, n_pad)
    y = pl.pallas_call(
        head_kernel,
        out_shape=jax.ShapeDtypeStruct((n_pad, op), jnp.float32),
        grid=(n_pad // rb,),
        in_specs=[pl.BlockSpec((rb, H), lambda r: (r, 0)),
                  pl.BlockSpec((rb, H), lambda r: (r, 0)),
                  pl.BlockSpec((2 * H, op), lambda r: (0, 0)),
                  pl.BlockSpec((1, op), lambda r: (0, 0))],
        out_specs=pl.BlockSpec((rb, op), lambda r: (r, 0)),
        compiler_params=_cp(("parallel",)),
    )(xf, xb, w_out, b_out)
    return y[:n, :out_size]


# ----------------------------------------------------------------------------
# One-time weight packing
# ----------------------------------------------------------------------------
def _reorder_gates(a):
    """PyTorch gate order [i, f, g, o] -> kernel order [i, f, o, g] along the leading axis."""
    H = a.shape[0] // 4
    return jnp.concatenate([a[:2 * H], a[3 * H:], a[2 * H:3 * H]], axis=0)


def prepare_params(params, matmul_dtype=jnp.bfloat16):
    """Transpose / gate-reorder / bias-fold / block-diag-pack weights once (not per forward).

    Default bf16 matmul weights (full-rate MXU, half the weight DMA); accumulation and the
    gate math / h / c state stay f32.
    """
    H = params["lstm"][0]["fwd"][1].shape[1]
    if H % LANE != 0:
        # TODO(synk): pad the hidden dimension to a multiple of 128 to support arbitrary H
        #             (e.g. the module default rnn_hidden=1028).
        raise ValueError(f"rnn_hidden must be a multiple of {LANE} for the Pallas kernel")
    layers = []
    for layer in params["lstm"]:
        w_in_cols, b_cols, w_hh_dirs = [], [], []
        for dname in ("fwd", "bwd"):
            w_ih, w_hh, b_ih, b_hh = layer[dname]
            w_in_cols.append(_reorder_gates(w_ih).T)        # (D_in, 4H) cols [i f o g]
            b_cols.append(_reorder_gates(b_ih + b_hh))      # (4H,)
            w_hh_dirs.append(_reorder_gates(w_hh).T)        # (H, 4H)   cols [i f o g]
        # Block-diagonal recurrent weights with per-gate interleaved columns:
        #   rows [h_f | h_b], cols [i_f i_b | f_f f_b | o_f o_b | g_f g_b]
        wf, wb = w_hh_dirs
        zed = jnp.zeros((H, H), jnp.float32)
        bd_cols = []
        for j in range(4):
            bd_cols.append(jnp.concatenate([wf[:, j * H:(j + 1) * H], zed], axis=0))
            bd_cols.append(jnp.concatenate([zed, wb[:, j * H:(j + 1) * H]], axis=0))
        w_bd = jnp.concatenate(bd_cols, axis=1)             # (2H, 8H)
        layers.append({
            "w_in": jnp.concatenate(w_in_cols, axis=1).astype(matmul_dtype),  # (D_in, 8H)
            "b_in": jnp.concatenate(b_cols)[None, :].astype(jnp.float32),     # (1, 8H)
            "w_hh": w_bd.astype(matmul_dtype),                                # (2H, 8H)
        })
    O, H2 = params["outp_w"].shape
    OP = _round_up(O, LANE)
    w_out = jnp.zeros((H2, OP), jnp.float32).at[:, :O].set(params["outp_w"].T)
    b_out = jnp.zeros((1, OP), jnp.float32).at[0, :O].set(params["outp_b"])
    return {"layers": layers,
            "w_out": w_out.astype(matmul_dtype),
            "b_out": b_out,
            "out_size": O}


# ----------------------------------------------------------------------------
# Forward pass (mirrors TorchRNNEncoder.forward, eval mode, inp_len=None branch)
# ----------------------------------------------------------------------------
def torch_rnn_encoder_forward(prepped, inp, inp_len=None, *, unroll=4, max_time_chunk=None):
    """inp: (B, T, F) batch-first. Returns (out, inp_len) with out: (B, T, output_size)."""
    # TODO(synk): pack_padded_sequence masking for inp_len is not implemented.
    if inp.ndim == 2:
        inp = inp[None, ...]
    B, T, _ = inp.shape
    # time-major; only the raw input / final output cross this transpose (activations stay put)
    x = jnp.transpose(inp, (1, 0, 2)).astype(jnp.float32)
    xs = x.reshape(T * B, -1)
    hf = hb = None
    for li, layer in enumerate(prepped["layers"]):
        src = xs if li == 0 else (hf.reshape(T * B, -1), hb.reshape(T * B, -1))
        gxf, gxb = run_projection(src, layer["w_in"], layer["b_in"])   # hoisted big GEMM
        hf, hb = run_bilstm(gxf.reshape(T, B, -1), gxb.reshape(T, B, -1), layer["w_hh"],
                            unroll=unroll, max_time_chunk=max_time_chunk)
        # TODO(synk): fuse the next layer's input projection into the recurrence epilogue to
        #             avoid the per-layer (T, B, H) HBM round trip of the activations.
    out = run_head(hf.reshape(T * B, -1), hb.reshape(T * B, -1),
                   prepped["w_out"], prepped["b_out"], prepped["out_size"])
    out = out.reshape(T, B, -1).transpose(1, 0, 2)                     # back to (B, T, O)
    return out, inp_len


# ----------------------------------------------------------------------------
# Deterministic parameter construction (PyTorch LSTM shapes / gate order)
# ----------------------------------------------------------------------------
def init_params(key, input_size, output_size, rnn_hidden, rnn_layers):
    H = rnn_hidden
    k = 1.0 / np.sqrt(H)
    layers = []
    for l in range(rnn_layers):
        d_in = input_size if l == 0 else 2 * H
        layer = {}
        for d in ("fwd", "bwd"):
            key, k1, k2, k3, k4 = jax.random.split(key, 5)
            layer[d] = (
                jax.random.uniform(k1, (4 * H, d_in), jnp.float32, -k, k),  # weight_ih
                jax.random.uniform(k2, (4 * H, H), jnp.float32, -k, k),     # weight_hh
                jax.random.uniform(k3, (4 * H,), jnp.float32, -k, k),       # bias_ih
                jax.random.uniform(k4, (4 * H,), jnp.float32, -k, k),       # bias_hh
            )
        layers.append(layer)
    key, ko1, ko2 = jax.random.split(key, 3)
    ko = 1.0 / np.sqrt(2 * H)
    return {
        "lstm": layers,
        "outp_w": jax.random.uniform(ko1, (output_size, 2 * H), jnp.float32, -ko, ko),
        "outp_b": jax.random.uniform(ko2, (output_size,), jnp.float32, -ko, ko),
    }


# ----------------------------------------------------------------------------
# Pure-JAX reference (PyTorch math, original gate order) for the correctness check
# ----------------------------------------------------------------------------
def _ref_lstm_layer(x_tm, w_ih, w_hh, b_ih, b_hh):
    H = w_hh.shape[1]
    b = b_ih + b_hh

    def step(carry, x_t):
        h, c = carry
        g = x_t @ w_ih.T + h @ w_hh.T + b
        i = jax.nn.sigmoid(g[:, :H])
        f = jax.nn.sigmoid(g[:, H:2 * H])
        gg = jnp.tanh(g[:, 2 * H:3 * H])
        o = jax.nn.sigmoid(g[:, 3 * H:])
        c = f * c + i * gg
        h = o * jnp.tanh(c)
        return (h, c), h

    B = x_tm.shape[1]
    h0 = jnp.zeros((B, H), jnp.float32)
    _, hs = lax.scan(step, (h0, h0), x_tm)
    return hs


def _ref_forward(params, inp):
    x = jnp.transpose(inp, (1, 0, 2)).astype(jnp.float32)
    for layer in params["lstm"]:
        fwd = _ref_lstm_layer(x, *layer["fwd"])
        bwd = _ref_lstm_layer(x[::-1], *layer["bwd"])[::-1]
        x = jnp.concatenate([fwd, bwd], axis=-1)
    out = jax.nn.sigmoid(x @ params["outp_w"].T + params["outp_b"])
    return jnp.transpose(out, (1, 0, 2))


# ----------------------------------------------------------------------------
if __name__ == "__main__":
    B, T, F_IN = 2, 8, 16
    H, LAYERS, OUT = 128, 3, 8   # H multiple of 128 keeps every gate slice lane-aligned

    key = jax.random.PRNGKey(0)
    key, kx = jax.random.split(key)
    inp = jax.random.normal(kx, (B, T, F_IN), jnp.float32)

    raw = init_params(key, F_IN, OUT, H, LAYERS)
    ref = jax.block_until_ready(_ref_forward(raw, inp))

    # 1) f32 matmul weights: tight check against the pure-JAX reference.
    prepped_f32 = prepare_params(raw, matmul_dtype=jnp.float32)
    out_f32, _ = torch_rnn_encoder_forward(prepped_f32, inp, inp_len=None)
    out_f32 = jax.block_until_ready(out_f32)
    np.testing.assert_allclose(np.asarray(out_f32), np.asarray(ref), rtol=1e-4, atol=1e-4)
    assert out_f32.shape == (B, T, OUT)

    # 2) multi-chunk + padded-time path (forced small time chunk): still exact.
    out_chunk, _ = torch_rnn_encoder_forward(prepped_f32, inp, inp_len=None, max_time_chunk=3)
    out_chunk = jax.block_until_ready(out_chunk)
    np.testing.assert_allclose(np.asarray(out_chunk), np.asarray(ref), rtol=1e-4, atol=1e-4)

    # 3) default bf16 matmul weights (f32 accumulation / state): loose tolerance.
    prepped_bf16 = prepare_params(raw)
    out_bf16, _ = torch_rnn_encoder_forward(prepped_bf16, inp, inp_len=None)
    out_bf16 = jax.block_until_ready(out_bf16)
    np.testing.assert_allclose(np.asarray(out_bf16), np.asarray(ref), rtol=5e-2, atol=5e-2)

    print("KERNEL_OK")
</pallas_src>

<mosaic_0001>
module attributes {stable_mosaic.version = 11 : i64} {
  func.func @proj1_kernel(%arg0: i32, %arg1: memref<16x16xf32, #tpu.memory_space<vmem>>, %arg2: memref<16x1024xf32, #tpu.memory_space<vmem>>, %arg3: memref<1x1024xf32, #tpu.memory_space<vmem>>, %arg4: memref<16x512xf32, #tpu.memory_space<vmem>>, %arg5: memref<16x512xf32, #tpu.memory_space<vmem>>) attributes {dimension_semantics = [#tpu.dimension_semantics<parallel>], iteration_bounds = array<i64: 1>, scalar_prefetch = 0 : i64, scratch_operands = 0 : i64, tpu.core_type = #tpu.core_type<tc>, window_params = [{transform_indices = @transform_0, window_bounds = array<i64: 16, 16>}, {pipeline_mode = #tpu.pipeline_mode<synchronous>, transform_indices = @transform_1, window_bounds = array<i64: 16, 1024>}, {pipeline_mode = #tpu.pipeline_mode<synchronous>, transform_indices = @transform_2, window_bounds = array<i64: 1, 1024>}, {transform_indices = @transform_3, window_bounds = array<i64: 16, 512>}, {transform_indices = @transform_4, window_bounds = array<i64: 16, 512>}]} {
    %c0 = arith.constant 0 : index
    %c0_0 = arith.constant 0 : index
    %0 = vector.load %arg1[%c0, %c0_0] : memref<16x16xf32, #tpu.memory_space<vmem>>, vector<16x16xf32>
    %c0_1 = arith.constant 0 : index
    %c0_2 = arith.constant 0 : index
    %1 = vector.load %arg2[%c0_1, %c0_2] : memref<16x1024xf32, #tpu.memory_space<vmem>>, vector<16x1024xf32>
    %cst = arith.constant dense<0.000000e+00> : vector<16x1024xf32>
    %2 = tpu.matmul %0, %1, %cst {dimension_numbers = #tpu.dot_dimension_numbers<[1], [0], [0], [1], [0, 0, 1, 1], [], []>} : vector<16x16xf32>, vector<16x1024xf32>, vector<16x1024xf32> -> vector<16x1024xf32>
    %c0_3 = arith.constant 0 : index
    %c0_4 = arith.constant 0 : index
    %3 = vector.load %arg3[%c0_3, %c0_4] : memref<1x1024xf32, #tpu.memory_space<vmem>>, vector<1x1024xf32>
    %4 = vector.broadcast %3 : vector<1x1024xf32> to vector<16x1024xf32>
    %5 = arith.addf %2, %4 : vector<16x1024xf32>
    %6 = vector.extract_strided_slice %5 {offsets = [0, 0], sizes = [16, 512], strides = [1, 1]} : vector<16x1024xf32> to vector<16x512xf32>
    %c0_5 = arith.constant 0 : index
    %c0_6 = arith.constant 0 : index
    %7 = vector.load %arg4[%c0_5, %c0_6] : memref<16x512xf32, #tpu.memory_space<vmem>>, vector<16x512xf32>
    tpu.vector_store %arg4[%c0_5, %c0_6], %6 {strides = array<i32>} : memref<16x512xf32, #tpu.memory_space<vmem>>, vector<16x512xf32>,
    %8 = vector.extract_strided_slice %5 {offsets = [0, 512], sizes = [16, 512], strides = [1, 1]} : vector<16x1024xf32> to vector<16x512xf32>
    %c0_7 = arith.constant 0 : index
    %c0_8 = arith.constant 0 : index
    %9 = vector.load %arg5[%c0_7, %c0_8] : memref<16x512xf32, #tpu.memory_space<vmem>>, vector<16x512xf32>
    tpu.vector_store %arg5[%c0_7, %c0_8], %8 {strides = array<i32>} : memref<16x512xf32, #tpu.memory_space<vmem>>, vector<16x512xf32>,
    return
  }
  func.func @transform_0(%arg0: i32) -> (i32, i32) {
    %c0_i32 = arith.constant 0 : i32
    %c0_i32_0 = arith.constant 0 : i32
    return %arg0, %c0_i32 : i32, i32
  }
  func.func @transform_1(%arg0: i32) -> (i32, i32) {
    %c0_i32 = arith.constant 0 : i32
    %c0_i32_0 = arith.constant 0 : i32
    %c0_i32_1 = arith.constant 0 : i32
    return %c0_i32, %c0_i32_0 : i32, i32
  }
  func.func @transform_2(%arg0: i32) -> (i32, i32) {
    %c0_i32 = arith.constant 0 : i32
    %c0_i32_0 = arith.constant 0 : i32
    %c0_i32_1 = arith.constant 0 : i32
    return %c0_i32, %c0_i32_0 : i32, i32
  }
  func.func @transform_3(%arg0: i32) -> (i32, i32) {
    %c0_i32 = arith.constant 0 : i32
    %c0_i32_0 = arith.constant 0 : i32
    return %arg0, %c0_i32 : i32, i32
  }
  func.func @transform_4(%arg0: i32) -> (i32, i32) {
    %c0_i32 = arith.constant 0 : i32
    %c0_i32_0 = arith.constant 0 : i32
    return %arg0, %c0_i32 : i32, i32
  }
}

</mosaic_0001>

<bundles_post_ra>
// kernel: tpu_custom_call.1
= control target key start
LH: loop header
LB: loop body
LE: loop exit
PB: predicated region body
PF: predicated region fallthrough
CT: control target
= control target key end

     0   :  { %10 = vsyncpa [#allocation3], 0  ;;  %s754_s0 = inlined_call_operand.hbm [shape: f32[16,16], index: 0, kind: input, shape index: {}]   ;;  %s755_s1 = inlined_call_operand.hbm [shape: f32[16,1024], index: 1, kind: input, shape index: {}]   ;;  %s756_s2 = inlined_call_operand.hbm [shape: f32[1,1024], index: 2, kind: input, shape index: {}]   ;;  %s757_s3 = inlined_call_operand.hbm [shape: f32[16,512], index: 3, kind: output, shape index: {0}]   ;;  %s758_s4 = inlined_call_operand.hbm [shape: f32[16,512], index: 4, kind: output, shape index: {1}]  }
   0x1   :  { %11 = vsyncpa [#allocation6], 0 }
   0x2   :  { %12 = vsyncpa [#allocation4], 0 }
   0x3   :  { %13 = vsyncpa [#allocation10], 0  ;;  %s636_s15 = smov [#allocation5]   ;;  %s518_s19 = scalar_lea.hbm %s755_s1, 2048 }
   0x4   :  { %s31_s16 = sshll.u32 %s636_s15, 4  ;;  %p519_p0 = scmp.ne.s32.totalorder %s755_s1, %s518_s19  ;;  %s32_s16 = int_to_ptr.vmem [resolvable:$true] %s31_s16 }
   0x5   :  { %p522_p1 = scmp.lt.u32.totalorder %s518_s19, %s755_s1 }
   0x7   :  { %p524_p2 = pnand %p522_p1, %p519_p0 }
   0x9   :  { %527 = shalt.err (!%p524_p2)
}
   0xa   :  { %s528_s24 = scalar_lea.vmem %s32_s16, 2048  ;;  %p533_p4 = scmp.lt.s32.totalorder %s32_s16, %s32_s16 }
   0xb   :  { %p529_p3 = scmp.ne.s32.totalorder %s32_s16, %s528_s24  ;;  %p534_p5 = scmp.lt.s32.totalorder %s528_s24, %s528_s24 }
   0xd   :  { %p535_p6 = por %p534_p5, %p533_p4 }
   0xf   :  { %p536_p7 = pnand %p535_p6, %p529_p3 }
  0x11   :  { %539 = shalt.err (!%p536_p7)
}
  0x12   :  { %s637_s25 = smov 1024   ;;  %s638_s26 = smov 64  }
  0x13   :  { %37 = dma.hbm_to_vmem [thread:$0]  %s755_s1, 2048, %s32_s16, [#allocation6], %s637_s25, %s637_s25, %s638_s26  }
  0x14   :  { %s639_s29 = smov [#allocation2]   ;;  %s540_s7 = scalar_lea.hbm %s754_s0, 256 }
  0x15   :  { %s19_s30 = sshll.u32 %s639_s29, 4  ;;  %p541_p8 = scmp.ne.s32.totalorder %s754_s0, %s540_s7  ;;  %s20_s30 = int_to_ptr.vmem [resolvable:$true] %s19_s30 }
  0x16   :  { %p544_p9 = scmp.lt.u32.totalorder %s540_s7, %s754_s0 }
  0x18   :  { %p546_p10 = pnand %p544_p9, %p541_p8 }
  0x1a   :  { %549 = shalt.err (!%p546_p10)
}
  0x1b   :  { %s550_s12 = scalar_lea.vmem %s20_s30, 256  ;;  %p555_p12 = scmp.lt.s32.totalorder %s20_s30, %s20_s30 }
  0x1c   :  { %p551_p11 = scmp.ne.s32.totalorder %s20_s30, %s550_s12  ;;  %p556_p13 = scmp.lt.s32.totalorder %s550_s12, %s550_s12 }
  0x1e   :  { %p557_p0 = por %p556_p13, %p555_p12 }
  0x20   :  { %p558_p1 = pnand %p557_p0, %p551_p11 }
  0x22   :  { %561 = shalt.err (!%p558_p1)
}
  0x23   :  { %s640_s1 = smov 128   ;;  %s641_s13 = smov 8  }
  0x24   :  { %25 = dma.hbm_to_vmem [thread:$0]  %s754_s0, 256, %s20_s30, [#allocation3], %s640_s1, %s640_s1, %s641_s13  }
  0x25   :  { %s642_s16 = smov [#allocation7]   ;;  %s562_s20 = scalar_lea.hbm %s756_s2, 128 }
  0x26   :  { %s44_s17 = sshll.u32 %s642_s16, 4  ;;  %p563_p2 = scmp.ne.s32.totalorder %s756_s2, %s562_s20  ;;  %s45_s17 = int_to_ptr.vmem [resolvable:$true] %s44_s17 }
  0x27   :  { %p566_p3 = scmp.lt.u32.totalorder %s562_s20, %s756_s2 }
  0x29   :  { %p568_p4 = pnand %p566_p3, %p563_p2 }
  0x2b   :  { %571 = shalt.err (!%p568_p4)
}
  0x2c   :  { %s572_s25 = scalar_lea.vmem %s45_s17, 128  ;;  %p577_p6 = scmp.lt.s32.totalorder %s45_s17, %s45_s17 }
  0x2d   :  { %p573_p5 = scmp.ne.s32.totalorder %s45_s17, %s572_s25  ;;  %p578_p7 = scmp.lt.s32.totalorder %s572_s25, %s572_s25 }
  0x2f   :  { %p579_p8 = por %p578_p7, %p577_p6 }
  0x31   :  { %p580_p9 = pnand %p579_p8, %p573_p5 }
  0x33   :  { %583 = shalt.err (!%p580_p9)
}
  0x34   :  { %47 = dma.hbm_to_vmem [thread:$0]  %s756_s2, 128, %s45_s17, [#allocation6]  }
  0x35   :  { %628 = dma.done.wait [#allocation3], 256  }
  0x36   :  { %629 = vsyncadd [#allocation3], 4294967040 }
  0x37   :  { %630 = dma.done.wait [#allocation6], 2176  }
  0x38   :  { %631 = vsyncadd [#allocation6], 4294965120  ;;  %v643_v0 = vmov 0.0   ;;  %v60_v1 = vld [vmem:[#allocation5 + $0x8] sm:$0xff]  ;;  %v62_v3 = vld [vmem:[#allocation5 + $0x18] sm:$0xff]  ;;  %vm117_vm0 = vcmask 130048   ;;  %v77_v27 = vlaneseq }
  0x39   :  { %188 = vmatprep.mubr.f32.mxu0 %v643_v0  ;;  %265 = vmatprep.mubr.f32.mxu1 %v643_v0  ;;  %v68_v2 = vld [vmem:[#allocation5 + $0x48] sm:$0xff]  ;;  %v70_v5 = vld [vmem:[#allocation5 + $0x58] sm:$0xff]  ;;  %v59_v6 = vld [vmem:[#allocation5] sm:$0xff]  ;;  %s644_s2 = smov [#allocation8]  }
  0x3a   :  { %v490_v4 = vpack.c.bf16 %v68_v2, %v60_v1  ;;  %v67_v7 = vld [vmem:[#allocation5 + $0x40] sm:$0xff]  ;;  %v494_v8 = vpack.c.bf16 %v70_v5, %v62_v3  ;;  %v61_v10 = vld [vmem:[#allocation5 + $0x10] sm:$0xff]  ;;  %v64_v14 = vld [vmem:[#allocation5 + $0x28] sm:$0xff]  ;;  %v78_v28 = vshrl.u32 %v77_v27, 7  ;;  %s453_s27 = sshll.u32 %s644_s2, 4  ;;  %s717_s27 = int_to_ptr.vmem [resolvable:$true] %s453_s27 }
  0x3b   :  { %v492_v9 = vpack.c.bf16 %v67_v7, %v59_v6  ;;  %v69_v11 = vld [vmem:[#allocation5 + $0x50] sm:$0xff]  ;;  %v72_v15 = vld [vmem:[#allocation5 + $0x68] sm:$0xff]  ;;  %v66_v16 = vld [vmem:[#allocation5 + $0x38] sm:$0xff]  ;;  %s584_s28 = scalar_lea.vmem %s717_s27, 1024  ;;  %p589_p11 = scmp.lt.s32.totalorder %s717_s27, %s717_s27 }
  0x3c   :  { %v57_v12 = vld [vmem:[#allocation2] sm:$0xff]  ;;  %491 = vmatprep.subr.bf16.mxu0 %v490_v4  ;;  %v496_v13 = vpack.c.bf16 %v69_v11, %v61_v10  ;;  %495 = vmatprep.subr.bf16.mxu1 %v494_v8  ;;  %v498_v17 = vpack.c.bf16 %v72_v15, %v64_v14  ;;  %v74_v18 = vld [vmem:[#allocation5 + $0x78] sm:$0xff]  ;;  %v63_v19 = vld [vmem:[#allocation5 + $0x20] sm:$0xff]  ;;  %v79_v29 = vsub.s32 0, %v78_v28  ;;  %v87_v31 = vsub.s32 2, %v78_v28  ;;  %p585_p10 = scmp.ne.s32.totalorder %s717_s27, %s584_s28  ;;  %p590_p12 = scmp.lt.s32.totalorder %s584_s28, %s584_s28 }
  0x3d   :  { %493 = vmatpush1.bf16.msra.mxu0 %v492_v9  ;;  %v71_v20 = vld [vmem:[#allocation5 + $0x60] sm:$0xff]  ;;  %v502_v21 = vpack.c.bf16 %v74_v18, %v66_v16  ;;  %v65_v23 = vld [vmem:[#allocation5 + $0x30] sm:$0xff]  ;;  %v58_v26 = vld [vmem:[#allocation2 + $0x8] sm:$0xff]  ;;  %v83_v32 = vsub.s32 1, %v78_v28  ;;  %v91_v33 = vsub.s32 3, %v78_v28  ;;  %v95_v42 = vsub.s32 4, %v78_v28 }
  0x3e   :  { %497 = vmatpush1.bf16.msra.mxu1 %v496_v13  ;;  %v500_v22 = vpack.c.bf16 %v71_v20, %v63_v19  ;;  %v73_v24 = vld [vmem:[#allocation5 + $0x70] sm:$0xff]  ;;  %499 = vmatprep.subr.bf16.mxu0 %v498_v17  ;;  %v75_v30 = vld [vmem:[#allocation7] sm:$0xff]  ;;  %v103_v46 = vsub.s32 6, %v78_v28  ;;  %v99_v47 = vsub.s32 5, %v78_v28  ;;  %v107_v49 = vsub.s32 7, %v78_v28  ;;  %p591_p13 = por %p590_p12, %p589_p11 }
  0x3f   :  { %v504_v25 = vpack.c.bf16 %v73_v24, %v65_v23  ;;  %503 = vmatprep.subr.bf16.mxu1 %v502_v21  ;;  %v80_v34 = vrot.slane %v75_v30, %v79_v29  ;;  %v88_v35 = vrot.slane %v75_v30, %v87_v31  ;;  %v84_v36 = vrot.slane %v75_v30, %v83_v32 }
  0x40   :  { %482 = vmatmul.mubr.msk.f32.vlgmr.msra.gmra.mrb[0].mxu0 %vm117_vm0, %v57_v12  ;;  %v92_v37 = vrot.slane %v75_v30, %v91_v33  ;;  %v96_v54 = vrot.slane %v75_v30, %v95_v42  ;;  %v104_v58 = vrot.slane %v75_v30, %v103_v46  ;;  %v100_v59 = vrot.slane %v75_v30, %v99_v47  ;;  %p592_p0 = pnand %p591_p13, %p585_p10 }
  0x41   :  { %484 = vmatmul.mubr.msk.f32.vlgmr.msra.gmra.mrb[0].mxu1 %vm117_vm0, %v57_v12  ;;  %501 = vmatpush1.bf16.msra.mxu0 %v500_v22  ;;  %v108_v61 = vrot.slane %v75_v30, %v107_v49 }
  0x42   :  { %505 = vmatpush1.bf16.msra.mxu1 %v504_v25  ;;  %194 = vmatprep.mubr.f32.mxu0 %v643_v0 }
  0x43   :  { %271 = vmatprep.mubr.f32.mxu1 %v643_v0 }
  0x44   :  { %483 = vmatmul.mubr.msk.f32.gmra.mrb[2].mxu0 %vm117_vm0, %v58_v26 }
  0x45   :  { %485 = vmatmul.mubr.msk.f32.gmra.mrb[2].mxu1 %vm117_vm0, %v58_v26  ;;  %342 = vmatprep.mubr.f32.mxu0 %v643_v0 }
  0x46   :  { %419 = vmatprep.mubr.f32.mxu1 %v643_v0 }
  0x48   :  { %486 = vmatmul.mubr.msk.f32.vlgmr.msra.gmra.mrb[4].mxu0 %vm117_vm0, %v57_v12 }
  0x49   :  { %488 = vmatmul.mubr.msk.f32.vlgmr.msra.gmra.mrb[4].mxu1 %vm117_vm0, %v57_v12  ;;  %348 = vmatprep.mubr.f32.mxu0 %v643_v0 }
  0x4a   :  { %425 = vmatprep.mubr.f32.mxu1 %v643_v0 }
  0x4c   :  { %487 = vmatmul.mubr.msk.f32.gmra.mrb[6].mxu0 %vm117_vm0, %v58_v26 }
  0x4d   :  { %489 = vmatmul.mubr.msk.f32.gmra.mrb[6].mxu1 %vm117_vm0, %v58_v26 }
 0x113   :  { %v190_v38 = vpop.f32.mrb[0].mxu0 }
 0x114   :  { %v191_v39 = vadd.f32 %v190_v38, %v80_v34  ;;  %v267_v40 = vpop.f32.mrb[0].mxu1  ;;  %v192_v41 = vpop.f32.mrb[1].mxu0 }
 0x115   :  { %v268_v43 = vadd.f32 %v267_v40, %v88_v35  ;;  %v193_v44 = vadd.f32 %v192_v41, %v84_v36  ;;  %v269_v45 = vpop.f32.mrb[1].mxu1 }
 0x116   :  { %432 = vst [vmem:[#allocation8] sm:$0xff] %v191_v39  ;;  %v270_v48 = vadd.f32 %v269_v45, %v92_v37 }
 0x117   :  { %434 = vst [vmem:[#allocation8 + $0x10] sm:$0xff] %v268_v43  ;;  %433 = vst [vmem:[#allocation8 + $0x8] sm:$0xff] %v193_v44  ;;  %v196_v50 = vpop.f32.mrb[2].mxu0 }
 0x118   :  { %435 = vst [vmem:[#allocation8 + $0x18] sm:$0xff] %v270_v48  ;;  %v197_v51 = vadd.f32 %v196_v50, %v80_v34  ;;  %v273_v52 = vpop.f32.mrb[2].mxu1  ;;  %v198_v53 = vpop.f32.mrb[3].mxu0 }
 0x119   :  { %v274_v55 = vadd.f32 %v273_v52, %v88_v35  ;;  %v199_v56 = vadd.f32 %v198_v53, %v84_v36  ;;  %v275_v57 = vpop.f32.mrb[3].mxu1 }
 0x11a   :  { %436 = vst [vmem:[#allocation8 + $0x20] sm:$0xff] %v197_v51  ;;  %v276_v60 = vadd.f32 %v275_v57, %v92_v37 }
 0x11b   :  { %438 = vst [vmem:[#allocation8 + $0x30] sm:$0xff] %v274_v55  ;;  %437 = vst [vmem:[#allocation8 + $0x28] sm:$0xff] %v199_v56  ;;  %v344_v62 = vpop.f32.mrb[4].mxu0 }
 0x11c   :  { %439 = vst [vmem:[#allocation8 + $0x38] sm:$0xff] %v276_v60  ;;  %v345_v63 = vadd.f32 %v344_v62, %v96_v54  ;;  %v421_v0 = vpop.f32.mrb[4].mxu1  ;;  %v346_v1 = vpop.f32.mrb[5].mxu0 }
 0x11d   :  { %v422_v2 = vadd.f32 %v421_v0, %v104_v58  ;;  %v347_v3 = vadd.f32 %v346_v1, %v100_v59  ;;  %v423_v4 = vpop.f32.mrb[5].mxu1 }
 0x11e   :  { %595 = shalt.err (!%p592_p0)
}
 0x11f   :  { %s596_s5 = scalar_lea.hbm %s757_s3, 1024 }
 0x120   :  { %p597_p1 = scmp.ne.s32.totalorder %s757_s3, %s596_s5  ;;  %p600_p2 = scmp.lt.u32.totalorder %s596_s5, %s757_s3 }
 0x122   :  { %p602_p3 = pnand %p600_p2, %p597_p1 }
 0x124   :  { %605 = shalt.err (!%p602_p3)
}
 0x125   :  { %s645_s10 = smov 512   ;;  %s646_s11 = smov 32   ;;  %440 = vst [vmem:[#allocation9] sm:$0xff] %v345_v63  ;;  %v424_v5 = vadd.f32 %v423_v4, %v108_v61  ;;  %442 = vst [vmem:[#allocation9 + $0x10] sm:$0xff] %v422_v2  ;;  %v350_v6 = vpop.f32.mrb[6].mxu0  ;;  %v427_v8 = vpop.f32.mrb[6].mxu1 }
 0x126   :  { %459 = dma.vmem_to_hbm [thread:$0]  %s717_s27, 1024, %s757_s3, [#allocation4], %s645_s10, %s645_s10, %s646_s11   ;;  %441 = vst [vmem:[#allocation9 + $0x8] sm:$0xff] %v347_v3  ;;  %v351_v7 = vadd.f32 %v350_v6, %v96_v54  ;;  %v352_v9 = vpop.f32.mrb[7].mxu0  ;;  %v428_v10 = vadd.f32 %v427_v8, %v104_v58  ;;  %v429_v12 = vpop.f32.mrb[7].mxu1 }
 0x127   :  { %s647_s13 = smov [#allocation9]   ;;  %443 = vst [vmem:[#allocation9 + $0x18] sm:$0xff] %v424_v5  ;;  %v353_v11 = vadd.f32 %v352_v9, %v100_v59  ;;  %v430_v13 = vadd.f32 %v429_v12, %v108_v61 }
 0x128   :  { %s465_s14 = sshll.u32 %s647_s13, 4  ;;  %444 = vst [vmem:[#allocation9 + $0x20] sm:$0xff] %v351_v7  ;;  %446 = vst [vmem:[#allocation9 + $0x30] sm:$0xff] %v428_v10  ;;  %s466_s14 = int_to_ptr.vmem [resolvable:$true] %s465_s14 }
 0x129   :  { %445 = vst [vmem:[#allocation9 + $0x28] sm:$0xff] %v353_v11  ;;  %447 = vst [vmem:[#allocation9 + $0x38] sm:$0xff] %v430_v13  ;;  %s606_s3 = scalar_lea.vmem %s466_s14, 1024  ;;  %p611_p5 = scmp.lt.s32.totalorder %s466_s14, %s466_s14 }
 0x12a   :  { %p607_p4 = scmp.ne.s32.totalorder %s466_s14, %s606_s3  ;;  %p612_p6 = scmp.lt.s32.totalorder %s606_s3, %s606_s3 }
 0x12c   :  { %p613_p7 = por %p612_p6, %p611_p5 }
 0x12e   :  { %p614_p8 = pnand %p613_p7, %p607_p4 }
 0x130   :  { %617 = shalt.err (!%p614_p8)
}
 0x131   :  { %s618_s17 = scalar_lea.hbm %s758_s4, 1024 }
 0x132   :  { %p619_p9 = scmp.ne.s32.totalorder %s758_s4, %s618_s17  ;;  %p622_p10 = scmp.lt.u32.totalorder %s618_s17, %s758_s4 }
 0x134   :  { %p624_p11 = pnand %p622_p10, %p619_p9 }
 0x136   :  { %627 = shalt.err (!%p624_p11)
}
 0x137   :  { %471 = dma.vmem_to_hbm [thread:$0]  %s466_s14, 1024, %s758_s4, [#allocation10], %s645_s10, %s645_s10, %s646_s11  }
 0x138   :  { %632 = dma.done.wait [#allocation4], 1024  }
 0x139   :  { %633 = vsyncadd [#allocation4], 4294966272 }
 0x13a   :  { %634 = dma.done.wait [#allocation10], 1024  }
 0x13b   :  { %635 = vsyncadd [#allocation10], 4294966272 }
 0x13c   :  { %478 = vsyncpa [#allocation3], 1 }
 0x13d   :  { %479 = vsyncpa [#allocation6], 1 }
 0x13e   :  { %480 = vsyncpa [#allocation4], 1 }
 0x13f   :  { %481 = vsyncpa [#allocation10], 1 }

</bundles_post_ra>
